<compile_context>
chip_gen: v5e
topology: v5e:2x2
jax: 0.10.0
libtpu: 0.0.40
codegen_flags: <defaults>
</compile_context>

<pallas_src>
import math
import functools

import jax
import jax.numpy as jnp
from jax.experimental import pallas as pl
from jax.experimental.pallas import tpu as pltpu


def _sbb_kernel(d_ref, f_ref, o_ref, *, norm_const):
    # d_ref: (1, tile_n)   scaled distances, dense on the 128-lane axis
    # f_ref: (R, 1)        frequencies on the sublane axis (grid-invariant)
    # o_ref: (R, tile_n)   lane-dense output tile
    d = d_ref[...]                                     # (1, tile_n)
    f = f_ref[...]                                     # (R, 1)
    inv = norm_const / d                               # (1, tile_n), exact divide
    o_ref[...] = (inv * jnp.sin(f * d)).astype(o_ref.dtype)   # (R, tile_n)


def _num_tensorcores():
    """Best-effort TensorCore count (v7x has 2 per chip); defaults to 1."""
    try:
        info = pltpu.get_tpu_info()
        for attr in ("num_cores", "core_count", "num_tensorcores", "cores_per_chip"):
            v = getattr(info, attr, None)
            if isinstance(v, int) and v > 0:
                return v
    except Exception:
        pass
    return 1


def _choose_tile_n(n, max_tile_n, num_cores):
    """Pick a lane-tile size (multiple of 128), balanced across TensorCores."""
    lanes_full = 128 * pl.cdiv(n, 128)
    tile = max(128, min(max_tile_n, lanes_full))
    if num_cores > 1:
        # Make the grid a multiple of the core count so each TC gets equal steps
        # (an odd grid on a 2-TC chip leaves one core tail-latency bound).
        grid = num_cores * pl.cdiv(pl.cdiv(n, tile), num_cores)
        tile = max(128, 128 * pl.cdiv(pl.cdiv(n, grid), 128))
    return tile


def spherical_bessel_basis_t(d_scaled, frequencies, cutoff, *,
                             max_tile_n=65536, num_cores=None,
                             out_dtype=jnp.float32):
    """Fast path: d_scaled [N], frequencies [R] -> lane-dense [R, N] result."""
    N = d_scaled.shape[0]
    R = frequencies.shape[0]
    norm_const = math.sqrt(2.0 / float(cutoff) ** 3)

    if num_cores is None:
        num_cores = _num_tensorcores()
    tile_n = _choose_tile_n(N, max_tile_n, num_cores)
    grid_n = pl.cdiv(N, tile_n)

    d2 = d_scaled.astype(jnp.float32).reshape(1, N)
    f2 = frequencies.astype(jnp.float32).reshape(R, 1)

    return pl.pallas_call(
        functools.partial(_sbb_kernel, norm_const=norm_const),
        out_shape=jax.ShapeDtypeStruct((R, N), out_dtype),
        grid_spec=pltpu.PrefetchScalarGridSpec(
            num_scalar_prefetch=0,
            grid=(grid_n,),
            in_specs=[
                pl.BlockSpec((1, tile_n), lambda i: (0, i)),   # d tile (lane-dense)
                pl.BlockSpec((R, 1), lambda i: (0, 0)),        # frequencies (replicated)
            ],
            out_specs=pl.BlockSpec((R, tile_n), lambda i: (0, i)),
        ),
        compiler_params=pltpu.CompilerParams(
            dimension_semantics=("parallel",),
        ),
    )(d2, f2)


def spherical_bessel_basis(d_scaled, frequencies, cutoff, **kwargs):
    """Module-faithful forward: returns [N, R] like the PyTorch module.

    NOTE: the transpose back to [N, R] is a second HBM pass; fused consumers
    should call spherical_bessel_basis_t and take the [R, N] layout directly.
    """
    return spherical_bessel_basis_t(d_scaled, frequencies, cutoff, **kwargs).T


if __name__ == "__main__":
    num_radial = 8
    cutoff = 6.0
    N = 300  # number of edges/distances; intentionally NOT a multiple of 128/tile

    # Deterministic parameter init matching __init__:
    #   frequencies = pi * arange(1, num_radial + 1)
    frequencies = jnp.pi * jnp.arange(1, num_radial + 1, dtype=jnp.float32)

    # Deterministic example input (scaled distances in (0, 1]).
    key = jax.random.PRNGKey(0)
    d_scaled = jax.random.uniform(key, (N,), dtype=jnp.float32,
                                  minval=0.05, maxval=1.0)

    out = spherical_bessel_basis(d_scaled, frequencies, cutoff)
    out = jax.block_until_ready(out)

    # Pure-JAX reference check (mirrors the PyTorch forward).
    norm_const = math.sqrt(2.0 / cutoff ** 3)
    ref = norm_const / d_scaled[:, None] * jnp.sin(frequencies[None, :] * d_scaled[:, None])
    assert out.shape == (N, num_radial)
    assert jnp.allclose(out, ref, atol=1e-5, rtol=1e-5), "mismatch vs reference"

    # Also validate the recommended lane-dense [R, N] fast path.
    out_t = jax.block_until_ready(
        spherical_bessel_basis_t(d_scaled, frequencies, cutoff))
    assert out_t.shape == (num_radial, N)
    assert jnp.allclose(out_t, ref.T, atol=1e-5, rtol=1e-5), "mismatch vs reference (T)"

    print("KERNEL_OK")
</pallas_src>

<mosaic_0001>
module attributes {stable_mosaic.version = 11 : i64} {
  func.func @_sbb_kernel(%arg0: i32, %arg1: memref<1x384xf32, #tpu.memory_space<vmem>>, %arg2: memref<8x1xf32, #tpu.memory_space<vmem>>, %arg3: memref<8x384xf32, #tpu.memory_space<vmem>>) attributes {dimension_semantics = [#tpu.dimension_semantics<parallel>], iteration_bounds = array<i64: 1>, scalar_prefetch = 0 : i64, scratch_operands = 0 : i64, tpu.core_type = #tpu.core_type<tc>, window_params = [{transform_indices = @transform_0, window_bounds = array<i64: 1, 384>}, {pipeline_mode = #tpu.pipeline_mode<synchronous>, transform_indices = @transform_1, window_bounds = array<i64: 8, 1>}, {transform_indices = @transform_2, window_bounds = array<i64: 8, 384>}]} {
    %c0 = arith.constant 0 : index
    %c0_0 = arith.constant 0 : index
    %0 = vector.load %arg1[%c0, %c0_0] : memref<1x384xf32, #tpu.memory_space<vmem>>, vector<1x384xf32>
    %c0_1 = arith.constant 0 : index
    %c0_2 = arith.constant 0 : index
    %1 = vector.load %arg2[%c0_1, %c0_2] : memref<8x1xf32, #tpu.memory_space<vmem>>, vector<8x1xf32>
    %cst = arith.constant 0.0962250456 : f32
    %2 = vector.broadcast %cst : f32 to vector<1x384xf32>
    %3 = arith.divf %2, %0 : vector<1x384xf32>
    %4 = vector.broadcast %1 : vector<8x1xf32> to vector<8x384xf32>
    %5 = vector.broadcast %0 : vector<1x384xf32> to vector<8x384xf32>
    %6 = arith.mulf %4, %5 : vector<8x384xf32>
    %7 = math.sin %6 : vector<8x384xf32>
    %8 = vector.broadcast %3 : vector<1x384xf32> to vector<8x384xf32>
    %9 = arith.mulf %8, %7 : vector<8x384xf32>
    %c0_3 = arith.constant 0 : index
    %c0_4 = arith.constant 0 : index
    %10 = vector.load %arg3[%c0_3, %c0_4] : memref<8x384xf32, #tpu.memory_space<vmem>>, vector<8x384xf32>
    tpu.vector_store %arg3[%c0_3, %c0_4], %9 {strides = array<i32>} : memref<8x384xf32, #tpu.memory_space<vmem>>, vector<8x384xf32>,
    return
  }
  func.func @transform_0(%arg0: i32) -> (i32, i32) {
    %c0_i32 = arith.constant 0 : i32
    %c0_i32_0 = arith.constant 0 : i32
    return %c0_i32, %arg0 : i32, i32
  }
  func.func @transform_1(%arg0: i32) -> (i32, i32) {
    %c0_i32 = arith.constant 0 : i32
    %c0_i32_0 = arith.constant 0 : i32
    %c0_i32_1 = arith.constant 0 : i32
    return %c0_i32, %c0_i32_0 : i32, i32
  }
  func.func @transform_2(%arg0: i32) -> (i32, i32) {
    %c0_i32 = arith.constant 0 : i32
    %c0_i32_0 = arith.constant 0 : i32
    return %c0_i32, %arg0 : i32, i32
  }
}

</mosaic_0001>

<bundles_post_ra>
// kernel: tpu_custom_call.1
= control target key start
LH: loop header
LB: loop body
LE: loop exit
PB: predicated region body
PF: predicated region fallthrough
CT: control target
= control target key end

     0   :  { %s977_s0 = inlined_call_operand.vmem [shape: f32[1,300], index: 0, kind: input, shape index: {}]   ;;  %s978_s1 = inlined_call_operand.vmem [shape: f32[8,1], index: 1, kind: input, shape index: {}]   ;;  %s979_s2 = inlined_call_operand.hbm [shape: f32[8,300], index: 2, kind: output, shape index: {}]  }
   0x1   :  { %v13_v0 = vld [vmem:[%s978_s1] sm:$0xff] }
   0x2   :  { %7 = vsyncpa [#allocation3], 0  ;;  %v584_v1 = vmov 0   ;;  %v614_v2 = vld [vmem:[%s977_s0] sm:$0x7]  ;;  %s591_s0 = smov [#allocation2]  }
   0x3   :  { %555 = vset.pattern.permute.xlu0 %v584_v1  ;;  %v35_v3 = vperm.slane %v614_v2, 0  ;;  %v36_v4 = vperm.slane %v614_v2, 1  ;;  %v37_v5 = vperm.slane %v614_v2, 2  ;;  %v585_v37 = vmov 683565275   ;;  %s527_s1 = sshll.u32 %s591_s0, 4  ;;  %s528_s1 = int_to_ptr.vmem [resolvable:$true] %s527_s1 }
   0x4   :  { %31 = vperm.xlu0 %555, %v13_v0   ;;  %v586_v39 = vmov 2475754826   ;;  %v587_v43 = vmov 2131351028   ;;  %v588_v46 = vmov 2102212464   ;;  %556 = vrcp.f32 %v614_v2 }
   0x5   :  { %v589_v49 = vmov 920167782   ;;  %v590_v52 = vmov 1326507024   ;;  %s529_s15 = sshll.u32 %s979_s2, 4  ;;  %s530_s15 = int_to_ptr.hbm [resolvable:$true] %s529_s15 }
  0x76   :  { %v32_v6 = vpop.permute.xlu0 %31 }
  0x77   :  { %v619_v7 = vmul.f32 %v35_v3, %v32_v6  ;;  %v621_v8 = vmul.f32 %v36_v4, %v32_v6  ;;  %v623_v9 = vmul.f32 %v37_v5, %v32_v6 }
  0x79   :  { %v44_v10 = vand.u32 2147483647, %v619_v7  ;;  %v47_v11 = vand.u32 2139095040, %v619_v7  ;;  %v199_v12 = vand.u32 2147483647, %v621_v8  ;;  %v202_v13 = vand.u32 2139095040, %v621_v8 }
  0x7a   :  { %v357_v18 = vand.u32 2139095040, %v623_v9 }
  0x7b   :  { %v48_v14 = vshrl.u32 %v47_v11, 23  ;;  %v51_v15 = vand.u32 8388607, %v44_v10  ;;  %v203_v16 = vshrl.u32 %v202_v13, 23  ;;  %v206_v17 = vand.u32 8388607, %v199_v12 }
  0x7c   :  { %v358_v25 = vshrl.u32 %v357_v18, 23 }
  0x7d   :  { %v538_v19 = vadd.s32 4294967169, %v48_v14  ;;  %v52_v20 = vor.u32 8388608, %v51_v15  ;;  %v541_v21 = vadd.s32 4294967169, %v203_v16  ;;  %v207_v22 = vor.u32 8388608, %v206_v17 }
  0x7e   :  { %v638_v31 = vadd.s32 4294967169, %v358_v25 }
  0x7f   :  { %v54_v23 = vadd.s32 1, %v538_v19  ;;  %v209_v24 = vadd.s32 1, %v541_v21  ;;  %v634_v26 = vshll.u32 %v52_v20, 8  ;;  %v636_v28 = vshll.u32 %v207_v22, 8 }
  0x81   :  { %vm55_vm0 = vcmp.gt.s32.totalorder %v54_v23, 0  ;;  %vm210_vm1 = vcmp.gt.s32.totalorder %v209_v24, 0  ;;  %v641_v33 = vand.u32 65535, %v634_v26  ;;  %v644_v34 = vshrl.u32 %v634_v26, 16 }
  0x82   :  { %v56_v27 = vsel %vm55_vm0, %v54_v23, 0  ;;  %v211_v30 = vsel %vm210_vm1, %v209_v24, 0  ;;  %v653_v41 = vand.u32 65535, %v636_v28 }
  0x83   :  { %v58_v29 = vand.u32 31, %v56_v27  ;;  %v646_v35 = vand.u32 31, %v211_v30  ;;  %v648_v36 = vshrl.u32 %v56_v27, 5  ;;  %v695_v23 = vshrl.u32 %v211_v30, 5 }
  0x85   :  { %v59_v32 = vsub.s32 32, %v58_v29  ;;  %v61_v38 = vshll.u32 %v585_v37, %v58_v29  ;;  %v64_v40 = vshll.u32 %v586_v39, %v58_v29  ;;  %v67_v45 = vshll.u32 %v587_v43, %v58_v29 }
  0x86   :  { %v70_v48 = vshll.u32 %v588_v46, %v58_v29  ;;  %v73_v51 = vshll.u32 %v589_v49, %v58_v29  ;;  %v664_v57 = vsub.s32 32, %v646_v35  ;;  %vm76_vm2 = vcmp.lt.s32.totalorder %v648_v36, 1 }
  0x87   :  { %v62_v42 = vshrl.u32 %v586_v39, %v59_v32  ;;  %v65_v44 = vshrl.u32 %v587_v43, %v59_v32  ;;  %v68_v47 = vshrl.u32 %v588_v46, %v59_v32  ;;  %v71_v50 = vshrl.u32 %v589_v49, %v59_v32 }
  0x88   :  { %v74_v53 = vshrl.u32 %v590_v52, %v59_v32  ;;  %vm77_vm3 = vcmp.lt.s32.totalorder %v648_v36, 2  ;;  %v60_v60 = vshrl.u32 %v585_v37, %v59_v32  ;;  %vm79_vm4 = vcmp.lt.s32.totalorder %v648_v36, 4 }
  0x89   :  { %v63_v54 = vor.u32 %v62_v42, %v61_v38  ;;  %v66_v55 = vor.u32 %v65_v44, %v64_v40  ;;  %v69_v56 = vor.u32 %v68_v47, %v67_v45  ;;  %v72_v58 = vor.u32 %v71_v50, %v70_v48 }
  0x8a   :  { %v75_v59 = vor.u32 %v74_v53, %v73_v51  ;;  %vm78_vm5 = vcmp.lt.s32.totalorder %v648_v36, 3  ;;  %v216_v3 = vshll.u32 %v585_v37, %v646_v35  ;;  %v217_v11 = vshrl.u32 %v586_v39, %v664_v57 }
  0x8b   :  { %v84_v61 = vsel %vm76_vm2, %v63_v54, %v66_v55  ;;  %v88_v62 = vsel %vm76_vm2, %v66_v55, %v69_v56  ;;  %v85_v63 = vsel %vm79_vm4, %v72_v58, 920167782  ;;  %v81_v4 = vsel %vm79_vm4, %v69_v56, 2102212464 }
  0x8c   :  { %v89_v0 = vsel %vm79_vm4, %v75_v59, 1326507024  ;;  %v86_v5 = vsel %vm78_vm5, %v69_v56, %v85_v63  ;;  %v219_v15 = vshll.u32 %v586_v39, %v646_v35  ;;  %v220_v16 = vshrl.u32 %v587_v43, %v664_v57 }
  0x8d   :  { %v90_v6 = vsel %vm78_vm5, %v72_v58, %v89_v0  ;;  %v87_v13 = vsel %vm77_vm3, %v84_v61, %v86_v5  ;;  %v80_v21 = vsel %vm76_vm2, %v60_v60, %v63_v54  ;;  %v82_v22 = vsel %vm78_vm5, %v66_v55, %v81_v4 }
  0x8e   :  { %v91_v14 = vsel %vm77_vm3, %v88_v62, %v90_v6  ;;  %v117_v19 = vand.u32 65535, %v87_v13  ;;  %v118_v20 = vshrl.u32 %v87_v13, 16  ;;  %v697_v24 = vor.u32 %v217_v11, %v216_v3 }
  0x8f   :  { %v95_v17 = vand.u32 65535, %v91_v14  ;;  %v96_v18 = vshrl.u32 %v91_v14, 16  ;;  %v701_v29 = vor.u32 %v220_v16, %v219_v15  ;;  %v223_v32 = vshrl.u32 %v588_v46, %v664_v57 }
  0x90   :  { %v120_v40 = vmul.u32 %v118_v20, %v641_v33  ;;  %v121_v42 = vmul.u32 %v117_v19, %v644_v34  ;;  %v222_v30 = vshll.u32 %v587_v43, %v646_v35  ;;  %v119_v47 = vmul.u32 %v117_v19, %v641_v33 }
  0x91   :  { %v98_v25 = vmul.u32 %v96_v18, %v641_v33  ;;  %v99_v27 = vmul.u32 %v95_v17, %v644_v34  ;;  %v97_v38 = vmul.u32 %v95_v17, %v641_v33  ;;  %v100_v44 = vmul.u32 %v96_v18, %v644_v34 }
  0x92   :  { %v122_v48 = vmul.u32 %v118_v20, %v644_v34  ;;  %v123_v54 = vshll.u32 %v120_v40, 16  ;;  %v125_v56 = vshll.u32 %v121_v42, 16  ;;  %v713_v58 = vor.u32 %v223_v32, %v222_v30 }
  0x93   :  { %v101_v45 = vshll.u32 %v98_v25, 16  ;;  %v102_v50 = vshrl.u32 %v98_v25, 16  ;;  %v103_v51 = vshll.u32 %v99_v27, 16  ;;  %v104_v53 = vshrl.u32 %v99_v27, 16 }
  0x94   :  { %vm127_vm7 = vc.u32 %v119_v47, %v123_v54  ;;  %v129_v60 = vadd.s32 %v123_v54, %v119_v47  ;;  %v226_v61 = vshrl.u32 %v589_v49, %v664_v57  ;;  %v225_v34 = vshll.u32 %v588_v46, %v646_v35 }
  0x95   :  { %vm105_vm6 = vc.u32 %v97_v38, %v101_v45  ;;  %v107_v55 = vadd.s32 %v101_v45, %v97_v38  ;;  %v128_v33 = vsel %vm127_vm7, 1, %v584_v1  ;;  %v228_v3 = vshll.u32 %v589_v49, %v646_v35 }
  0x96   :  { %v106_v59 = vsel %vm105_vm6, 1, %v584_v1  ;;  %v130_v0 = vadd.s32 %v128_v33, %v122_v48  ;;  %vm131_vm9 = vc.u32 %v129_v60, %v125_v56  ;;  %v227_v6 = vor.u32 %v226_v61, %v225_v34 }
  0x97   :  { %v108_v62 = vadd.s32 %v106_v59, %v100_v44  ;;  %vm109_vm8 = vc.u32 %v107_v55, %v103_v51  ;;  %v132_v5 = vsel %vm131_vm9, 1, %v584_v1  ;;  %v229_v11 = vshrl.u32 %v590_v52, %v664_v57 }
  0x98   :  { %v110_v63 = vsel %vm109_vm8, 1, %v584_v1  ;;  %v124_v13 = vshrl.u32 %v120_v40, 16  ;;  %v126_v14 = vshrl.u32 %v121_v42, 16  ;;  %v727_v15 = vadd.s32 %v129_v60, %v125_v56 }
  0x99   :  { %v112_v4 = vadd.s32 %v110_v63, %v108_v62  ;;  %v134_v16 = vadd.s32 %v132_v5, %v130_v0  ;;  %v230_v18 = vor.u32 %v229_v11, %v228_v3  ;;  %vm231_vm10 = vcmp.lt.s32.totalorder %v695_v23, 1 }
  0x9a   :  { %vm234_vm11 = vcmp.lt.s32.totalorder %v695_v23, 4  ;;  %vm233_vm12 = vcmp.lt.s32.totalorder %v695_v23, 3  ;;  %v239_v35 = vsel %vm231_vm10, %v697_v24, %v701_v29  ;;  %vm232_vm13 = vcmp.lt.s32.totalorder %v695_v23, 2 }
  0x9b   :  { %v113_v17 = vadd.s32 %v112_v4, %v102_v50  ;;  %v135_v19 = vadd.s32 %v134_v16, %v124_v13  ;;  %v240_v20 = vsel %vm234_vm11, %v227_v6, 920167782  ;;  %v243_v32 = vsel %vm231_vm10, %v701_v29, %v713_v58 }
  0x9c   :  { %v241_v27 = vsel %vm233_vm12, %v713_v58, %v240_v20  ;;  %v83_v38 = vsel %vm77_vm3, %v80_v21, %v82_v22  ;;  %v244_v30 = vsel %vm234_vm11, %v230_v18, 1326507024  ;;  %v249_v45 = vshrl.u32 %v636_v28, 16 }
  0x9d   :  { %v738_v25 = vadd.s32 %v113_v17, %v104_v53  ;;  %v136_v40 = vadd.s32 %v135_v19, %v126_v14  ;;  %v242_v42 = vsel %vm232_vm13, %v239_v35, %v241_v27  ;;  %v245_v44 = vsel %vm233_vm12, %v227_v6, %v244_v30 }
  0x9e   :  { %v272_v47 = vand.u32 65535, %v242_v42  ;;  %v246_v36 = vsel %vm232_vm13, %v243_v32, %v245_v44  ;;  %v273_v21 = vshrl.u32 %v242_v42, 16  ;;  %v364_v22 = vadd.s32 1, %v638_v31 }
  0x9f   :  { %vm139_vm14 = vc.u32 %v738_v25, %v727_v15  ;;  %v140_v48 = vadd.s32 1, %v136_v40  ;;  %v137_v50 = vmul.u32 %v634_v26, %v83_v38  ;;  %v250_v51 = vand.u32 65535, %v246_v36 }
  0xa0   :  { %v251_v53 = vshrl.u32 %v246_v36, 16  ;;  %v275_v55 = vmul.u32 %v273_v21, %v653_v41  ;;  %v276_v56 = vmul.u32 %v272_v47, %v249_v45  ;;  %v354_v62 = vand.u32 2147483647, %v623_v9 }
  0xa1   :  { %v141_v54 = vsel %vm139_vm14, %v140_v48, %v136_v40  ;;  %v254_v61 = vmul.u32 %v250_v51, %v249_v45  ;;  %v274_v33 = vmul.u32 %v272_v47, %v653_v41  ;;  %v277_v34 = vmul.u32 %v273_v21, %v249_v45 }
  0xa2   :  { %v142_v59 = vadd.s32 %v141_v54, %v137_v50  ;;  %v253_v60 = vmul.u32 %v251_v53, %v653_v41  ;;  %v278_v63 = vshll.u32 %v275_v55, 16  ;;  %vm365_vm15 = vcmp.gt.s32.totalorder %v364_v22, 0 }
  0xa3   :  { %v252_v26 = vmul.u32 %v250_v51, %v653_v41  ;;  %v255_v0 = vmul.u32 %v251_v53, %v249_v45  ;;  %v258_v4 = vshll.u32 %v254_v61, 16  ;;  %v280_v5 = vshll.u32 %v276_v56, 16 }
  0xa4   :  { %v143_v31 = vadd.s32 536870912, %v142_v59  ;;  %v256_v3 = vshll.u32 %v253_v60, 16  ;;  %vm282_vm0 = vc.u32 %v274_v33, %v278_v63  ;;  %v284_v6 = vadd.s32 %v278_v63, %v274_v33 }
  0xa5   :  { %v283_v14 = vsel %vm282_vm0, 1, %v584_v1  ;;  %v774_v18 = vand.u32 8388607, %v354_v62  ;;  %v236_v19 = vsel %vm234_vm11, %v713_v58, 2102212464  ;;  %v215_v20 = vshrl.u32 %v585_v37, %v664_v57 }
  0xa6   :  { %v768_v11 = vshrl.u32 %v143_v31, 30  ;;  %vm260_vm1 = vc.u32 %v252_v26, %v256_v3  ;;  %v262_v13 = vadd.s32 %v256_v3, %v252_v26  ;;  %v285_v17 = vadd.s32 %v283_v14, %v277_v34 }
  0xa7   :  { %v261_v16 = vsel %vm260_vm1, 1, %v584_v1  ;;  %vm286_vm2 = vc.u32 %v284_v6, %v280_v5  ;;  %v366_v38 = vsel %vm365_vm15, %v364_v22, 0  ;;  %v257_v42 = vshrl.u32 %v253_v60, 16 }
  0xa8   :  { %v145_v41 = vshll.u32 %v768_v11, 30  ;;  %v263_v35 = vadd.s32 %v261_v16, %v255_v0  ;;  %vm264_vm3 = vc.u32 %v262_v13, %v258_v4  ;;  %v287_v32 = vsel %vm286_vm2, 1, %v584_v1 }
  0xa9   :  { %v265_v27 = vsel %vm264_vm3, 1, %v584_v1  ;;  %v289_v44 = vadd.s32 %v287_v32, %v285_v17  ;;  %v235_v45 = vsel %vm231_vm10, %v215_v20, %v697_v24  ;;  %v237_v58 = vsel %vm233_vm12, %v701_v29, %v236_v19 }
  0xaa   :  { %v146_v40 = vsub.s32 %v142_v59, %v145_v41  ;;  %v267_v30 = vadd.s32 %v265_v27, %v263_v35  ;;  %v279_v47 = vshrl.u32 %v275_v55, 16  ;;  %v368_v57 = vand.u32 31, %v366_v38 }
  0xab   :  { %v259_v36 = vshrl.u32 %v254_v61, 16  ;;  %v281_v50 = vshrl.u32 %v276_v56, 16  ;;  %v238_v53 = vsel %vm232_vm13, %v235_v45, %v237_v58  ;;  %v797_v60 = vadd.s32 %v284_v6, %v280_v5 }
  0xac   :  { %vm147_vm4 = vcmp.lt.s32.totalorder %v146_v40, 0  ;;  %v148_v48 = vsub.s32 0, %v146_v40  ;;  %v268_v21 = vadd.s32 %v267_v30, %v257_v42  ;;  %v290_v22 = vadd.s32 %v289_v44, %v279_v47 }
  0xad   :  { %v795_v59 = vsub.s32 32, %v368_v57  ;;  %v138_v55 = vadd.s32 %v727_v15, %v738_v25  ;;  %v362_v61 = vor.u32 8388608, %v774_v18  ;;  %v292_v56 = vmul.u32 %v636_v28, %v238_v53 }
  0xae   :  { %v149_v51 = vsel %vm147_vm4, %v148_v48, %v146_v40  ;;  %v793_v54 = vadd.s32 %v268_v21, %v259_v36  ;;  %v291_v29 = vadd.s32 %v290_v22, %v281_v50  ;;  %v805_v34 = vshrl.u32 %v366_v38, 5 }
  0xaf   :  { %v150_v24 = vclz %v149_v51  ;;  %v374_v63 = vshll.u32 %v586_v39, %v368_v57  ;;  %v375_v31 = vshrl.u32 %v587_v43, %v795_v59  ;;  %v381_v26 = vshrl.u32 %v589_v49, %v795_v59 }
  0xb0   :  { %vm294_vm5 = vc.u32 %v793_v54, %v797_v60  ;;  %v295_v23 = vadd.s32 1, %v291_v29  ;;  %v378_v25 = vshrl.u32 %v588_v46, %v795_v59  ;;  %v380_v28 = vshll.u32 %v588_v46, %v368_v57 }
  0xb1   :  { %v539_v33 = vadd.s32 4294967294, %v150_v24  ;;  %v372_v4 = vshrl.u32 %v586_v39, %v795_v59  ;;  %v384_v5 = vshrl.u32 %v590_v52, %v795_v59  ;;  %v377_v14 = vshll.u32 %v587_v43, %v368_v57 }
  0xb2   :  { %v296_v15 = vsel %vm294_vm5, %v295_v23, %v291_v29  ;;  %v382_v16 = vor.u32 %v381_v26, %v380_v28  ;;  %v371_v18 = vshll.u32 %v585_v37, %v368_v57  ;;  %v821_v41 = vor.u32 %v375_v31, %v374_v63 }
  0xb3   :  { %vm540_vm6 = vcmp.lt.s32.totalorder %v539_v33, 0  ;;  %v297_v3 = vadd.s32 %v296_v15, %v292_v56  ;;  %v383_v46 = vshll.u32 %v589_v49, %v368_v57  ;;  %v824_v27 = vor.u32 %v378_v25, %v377_v14 }
  0xb4   :  { %v153_v0 = vsel %vm540_vm6, 0, %v539_v33  ;;  %v828_v52 = vor.u32 %v372_v4, %v371_v18  ;;  %vm389_vm7 = vcmp.lt.s32.totalorder %v805_v34, 4  ;;  %vm386_vm8 = vcmp.lt.s32.totalorder %v805_v34, 1 }
  0xb5   :  { %v154_v6 = vsub.s32 32, %v153_v0  ;;  %v158_v13 = vsub.s32 4294967266, %v153_v0  ;;  %v298_v17 = vadd.s32 536870912, %v297_v3  ;;  %v155_v19 = vshll.u32 %v146_v40, %v153_v0 }
  0xb6   :  { %v385_v32 = vor.u32 %v384_v5, %v383_v46  ;;  %v395_v42 = vsel %vm389_vm7, %v382_v16, 920167782  ;;  %v835_v49 = vshll.u32 %v362_v61, 8  ;;  %vm388_vm9 = vcmp.lt.s32.totalorder %v805_v34, 3 }
  0xb7   :  { %v156_v35 = vshrl.u32 %v138_v55, %v154_v6  ;;  %v159_v20 = vadd.s32 127, %v158_v13  ;;  %v826_v39 = vshrl.u32 %v298_v17, 30  ;;  %v398_v44 = vsel %vm386_vm8, %v821_v41, %v824_v27 }
  0xb8   :  { %v394_v58 = vsel %vm386_vm8, %v828_v52, %v821_v41  ;;  %v396_v47 = vsel %vm388_vm9, %v824_v27, %v395_v42  ;;  %v399_v57 = vsel %vm389_vm7, %v385_v32, 1326507024  ;;  %vm387_vm10 = vcmp.lt.s32.totalorder %v805_v34, 2 }
  0xb9   :  { %v157_v43 = vor.u32 %v156_v35, %v155_v19  ;;  %v160_v38 = vshll.u32 %v159_v20, 23  ;;  %v300_v30 = vshll.u32 %v826_v39, 30  ;;  %v400_v21 = vsel %vm388_vm9, %v382_v16, %v399_v57 }
  0xba   :  { %v401_v22 = vsel %vm387_vm10, %v398_v44, %v400_v21  ;;  %v403_v51 = vand.u32 65535, %v835_v49  ;;  %v397_v24 = vsel %vm387_vm10, %v394_v58, %v396_v47  ;;  %v404_v33 = vshrl.u32 %v835_v49, 16 }
  0xbb   :  { %v161_v40 = vor.u32 4788187, %v160_v38  ;;  %v301_v45 = vsub.s32 %v297_v3, %v300_v30  ;;  %v164_v36 = vcvt.s32.f32 %v157_v43  ;;  %v405_v29 = vand.u32 65535, %v401_v22 }
  0xbc   :  { %v406_v55 = vshrl.u32 %v401_v22, 16  ;;  %vm46_vm12 = vcmp.lt.s32.totalorder %v619_v7, 0  ;;  %vm863_vm13 = vcmp.le.f32.partialorder %v44_v10, 0.7853982  ;;  %v427_v15 = vand.u32 65535, %v397_v24 }
  0xbd   :  { %v162_v48 = vand.u32 2147483647, %v161_v40  ;;  %vm302_vm11 = vcmp.lt.s32.totalorder %v301_v45, 0  ;;  %v303_v50 = vsub.s32 0, %v301_v45  ;;  %v409_v26 = vmul.u32 %v405_v29, %v404_v33  ;;  %v884_v40 = vpop.eup %556 }
  0xbe   :  { %v408_v63 = vmul.u32 %v406_v55, %v403_v51  ;;  %v428_v25 = vshrl.u32 %v397_v24, 16  ;;  %v407_v3 = vmul.u32 %v405_v29, %v403_v51  ;;  %v410_v10 = vmul.u32 %v406_v55, %v404_v33 }
  0xbf   :  { %v165_v53 = vmul.f32 %v164_v36, %v162_v48  ;;  %v304_v61 = vsel %vm302_vm11, %v303_v50, %v301_v45  ;;  %v413_v16 = vshll.u32 %v409_v26, 16  ;;  %v293_v46 = vadd.s32 %v797_v60, %v793_v54 }
  0xc0   :  { %v305_v23 = vclz %v304_v61  ;;  %v411_v4 = vshll.u32 %v408_v63, 16  ;;  %v430_v18 = vmul.u32 %v428_v25, %v403_v51  ;;  %v431_v35 = vmul.u32 %v427_v15, %v404_v33 }
  0xc1   :  { %v166_v56 = vxor.u32 2147483648, %v165_v53  ;;  %v429_v57 = vmul.u32 %v427_v15, %v403_v51  ;;  %v412_v48 = vshrl.u32 %v408_v63, 16  ;;  %v432_v36 = vmul.u32 %v428_v25, %v404_v33 }
  0xc2   :  { %v542_v0 = vadd.s32 4294967294, %v305_v23  ;;  %vm415_vm15 = vc.u32 %v407_v3, %v411_v4  ;;  %v417_v13 = vadd.s32 %v411_v4, %v407_v3  ;;  %v433_v43 = vshll.u32 %v430_v18, 16 }
  0xc3   :  { %v167_v28 = vsel %vm46_vm12, %v166_v56, %v165_v53  ;;  %v416_v17 = vsel %vm415_vm15, 1, %v584_v1  ;;  %v435_v54 = vshll.u32 %v431_v35, 16  ;;  %v15_v22 = vmul.f32 %v884_v40, %v614_v2 }
  0xc4   :  { %v873_v5 = vsel %vm863_vm13, %v619_v7, %v167_v28  ;;  %vm543_vm14 = vcmp.lt.s32.totalorder %v542_v0, 0  ;;  %v418_v32 = vadd.s32 %v416_v17, %v410_v10  ;;  %vm419_vm0 = vc.u32 %v417_v13, %v413_v16 }
  0xc5   :  { %v877_v6 = vmul.f32 %v873_v5, %v873_v5  ;;  %v308_v14 = vsel %vm543_vm14, 0, %v542_v0  ;;  %v420_v30 = vsel %vm419_vm0, 1, %v584_v1  ;;  %vm437_vm1 = vc.u32 %v429_v57, %v433_v43 }
  0xc6   :  { %v309_v19 = vsub.s32 32, %v308_v14  ;;  %v313_v20 = vsub.s32 4294967266, %v308_v14  ;;  %v310_v44 = vshll.u32 %v301_v45, %v308_v14  ;;  %v422_v47 = vadd.s32 %v420_v30, %v418_v32 }
  0xc7   :  { %v180_v38 = vmul.f32 -0.00019511016, %v877_v6  ;;  %v439_v50 = vadd.s32 %v433_v43, %v429_v57  ;;  %v438_v29 = vsel %vm437_vm1, 1, %v584_v1  ;;  %v391_v45 = vsel %vm389_vm7, %v824_v27, 2102212464 }
  0xc8   :  { %v311_v42 = vshrl.u32 %v293_v46, %v309_v19  ;;  %v314_v58 = vadd.s32 127, %v313_v20  ;;  %v423_v24 = vadd.s32 %v422_v47, %v412_v48  ;;  %v440_v51 = vadd.s32 %v438_v29, %v432_v36 }
  0xc9   :  { %v181_v53 = vadd.f32 0.008332121, %v180_v38  ;;  %vm441_vm2 = vc.u32 %v439_v50, %v435_v54  ;;  %v173_v61 = vmul.f32 -0.001358992, %v877_v6  ;;  %v370_v33 = vshrl.u32 %v585_v37, %v795_v59 }
  0xca   :  { %v312_v60 = vor.u32 %v311_v42, %v310_v44  ;;  %v315_v21 = vshll.u32 %v314_v58, 23  ;;  %v414_v56 = vshrl.u32 %v409_v26, 16  ;;  %v442_v23 = vsel %vm441_vm2, 1, %v584_v1 }
  0xcb   :  { %v434_v25 = vshrl.u32 %v430_v18, 16  ;;  %v444_v28 = vadd.s32 %v442_v23, %v440_v51  ;;  %v182_v0 = vmul.f32 %v181_v53, %v877_v6  ;;  %v390_v27 = vsel %vm386_vm8, %v370_v33, %v828_v52 }
  0xcc   :  { %v316_v55 = vor.u32 4788187, %v315_v21  ;;  %v319_v15 = vcvt.s32.f32 %v312_v60  ;;  %v392_v3 = vsel %vm388_vm9, %v821_v41, %v391_v45  ;;  %v903_v4 = vadd.s32 %v423_v24, %v414_v56 }
  0xcd   :  { %v436_v59 = vshrl.u32 %v431_v35, 16  ;;  %v445_v26 = vadd.s32 %v444_v28, %v434_v25  ;;  %v174_v1 = vadd.f32 0.041655596, %v173_v61  ;;  %v905_v10 = vadd.s32 %v439_v50, %v435_v54 }
  0xce   :  { %v317_v63 = vand.u32 2147483647, %v316_v55  ;;  %v393_v14 = vsel %vm387_vm10, %v390_v27, %v392_v3  ;;  %v16_v17 = vsub.f32 1.0, %v15_v22  ;;  %v183_v18 = vadd.f32 -0.16666654, %v182_v0 }
  0xcf   :  { %v446_v16 = vadd.s32 %v445_v26, %v436_v59  ;;  %vm201_vm3 = vcmp.lt.s32.totalorder %v621_v8, 0  ;;  %vm449_vm4 = vc.u32 %v903_v4, %v905_v10  ;;  %v168_v41 = vsub.s32 4, %v768_v11 }
  0xd0   :  { %v320_v37 = vmul.f32 %v319_v15, %v317_v63  ;;  %vm915_vm5 = vcmp.le.f32.partialorder %v199_v12, 0.7853982  ;;  %v175_v19 = vmul.f32 %v174_v1, %v877_v6  ;;  %v323_v35 = vsub.s32 4, %v826_v39 }
  0xd1   :  { %v450_v46 = vadd.s32 1, %v446_v16  ;;  %v447_v32 = vmul.u32 %v835_v49, %v393_v14  ;;  %v184_v12 = vmul.f32 %v183_v18, %v877_v6  ;;  %v17_v30 = vmul.f32 %v884_v40, %v16_v17 }
  0xd2   :  { %v321_v13 = vxor.u32 2147483648, %v320_v37  ;;  %v169_v44 = vsel %vm46_vm12, %v168_v41, %v768_v11  ;;  %vm19_vm6 = vweird.f32 %v614_v2  ;;  %v176_v57 = vadd.f32 -0.4999988, %v175_v19 }
  0xd3   :  { %v451_v38 = vsel %vm449_vm4, %v450_v46, %v446_v16  ;;  %v324_v49 = vsel %vm201_vm3, %v323_v35, %v826_v39  ;;  %vm20_vm7 = vweird.f32 %v884_v40  ;;  %v23_v36 = vand.u32 2147483647, %v614_v2 }
  0xd4   :  { %v322_v34 = vsel %vm201_vm3, %v321_v13, %v320_v37  ;;  %v452_v42 = vadd.s32 %v451_v38, %v447_v32  ;;  %v25_v21 = vand.u32 2147483648, %v614_v2  ;;  %v171_v11 = vsel %vm863_vm13, 0, %v169_v44  ;;  %vm948_vm8 = vmor %vm19_vm6, %vm20_vm7 }
  0xd5   :  { %v325_v20 = vsel %vm915_vm5, %v621_v8, %v322_v34  ;;  %v185_v50 = vadd.f32 1.0, %v184_v12  ;;  %v18_v53 = vadd.f32 %v884_v40, %v17_v30  ;;  %v326_v39 = vsel %vm915_vm5, 0, %v324_v49 }
  0xd6   :  { %v327_v43 = vmul.f32 %v325_v20, %v325_v20  ;;  %v453_v48 = vadd.s32 536870912, %v452_v42  ;;  %v177_v45 = vmul.f32 %v176_v57, %v877_v6  ;;  %v188_v51 = vadd.s32 3, %v171_v11 }
  0xd7   :  { %v26_v56 = vor.u32 1.1754944e-38, %v25_v21  ;;  %v186_v23 = vmul.f32 %v185_v50, %v873_v5  ;;  %v343_v63 = vadd.s32 3, %v326_v39  ;;  %v22_v2 = vsel %vm948_vm8, %v884_v40, %v18_v53 }
  0xd8   :  { %v328_v58 = vmul.f32 -0.001358992, %v327_v43  ;;  %v335_v47 = vmul.f32 -0.00019511016, %v327_v43  ;;  %v941_v22 = vshrl.u32 %v453_v48, 30  ;;  %vm24_vm9 = vcmp.eq.f32.partialorder %v23_v36, 8.507059e+37 }
  0xd9   :  { %v178_v0 = vadd.f32 1.0, %v177_v45  ;;  %v189_v27 = vand.u32 3, %v188_v51  ;;  %v27_v59 = vsel %vm24_vm9, %v26_v56, %v22_v2  ;;  %v192_v26 = vxor.u32 2147483648, %v186_v23 }
  0xda   :  { %v329_v54 = vadd.f32 0.041655596, %v328_v58  ;;  %v336_v60 = vadd.f32 0.008332121, %v335_v47  ;;  %v455_v31 = vshll.u32 %v941_v22, 30  ;;  %v344_v1 = vand.u32 3, %v343_v63 }
  0xdb   :  { %v195_v16 = vxor.u32 2147483648, %v178_v0  ;;  %v958_v18 = vmul.f32 0.096225046, %v27_v59  ;;  %vm191_vm11 = vcmp.eq.s32.totalorder %v189_v27, 0  ;;  %vm190_vm12 = vcmp.lt.s32.totalorder %v189_v27, 2 }
  0xdc   :  { %v330_v24 = vmul.f32 %v329_v54, %v327_v43  ;;  %v337_v29 = vmul.f32 %v336_v60, %v327_v43  ;;  %v456_v15 = vsub.s32 %v452_v42, %v455_v31  ;;  %v193_v52 = vsel %vm191_vm11, %v178_v0, %v192_v26 }
  0xdd   :  { %vm194_vm13 = vcmp.eq.s32.totalorder %v189_v27, 2  ;;  %vm346_vm14 = vcmp.eq.s32.totalorder %v344_v1, 0  ;;  %vm345_vm15 = vcmp.lt.s32.totalorder %v344_v1, 2  ;;  %vm349_vm0 = vcmp.eq.s32.totalorder %v344_v1, 2 }
  0xde   :  { %v331_v61 = vadd.f32 -0.4999988, %v330_v24  ;;  %v338_v33 = vadd.f32 -0.16666654, %v337_v29  ;;  %vm457_vm10 = vcmp.lt.s32.totalorder %v456_v15, 0  ;;  %v458_v6 = vsub.s32 0, %v456_v15 }
  0xdf   :  { %v196_v46 = vsel %vm194_vm13, %v195_v16, %v186_v23  ;;  %v448_v35 = vadd.s32 %v905_v10, %v903_v4  ;;  %vm187_vm2 = vweird.f32 %v619_v7  ;;  %vm342_vm3 = vweird.f32 %v621_v8 }
  0xe0   :  { %v332_v25 = vmul.f32 %v331_v61, %v327_v43  ;;  %v339_v28 = vmul.f32 %v338_v33, %v327_v43  ;;  %v459_v13 = vsel %vm457_vm10, %v458_v6, %v456_v15  ;;  %v197_v32 = vsel %vm190_vm12, %v193_v52, %v196_v46 }
  0xe1   :  { %v460_v14 = vclz %v459_v13  ;;  %v198_v58 = vsel %vm187_vm2, nan, %v197_v32  ;;  %v510_v48 = vperm.slane %v958_v18, 0  ;;  %v511_v4 = vperm.slane %v958_v18, 1 }
  0xe2   :  { %v333_v3 = vadd.f32 1.0, %v332_v25  ;;  %v340_v37 = vadd.f32 1.0, %v339_v28  ;;  %vm356_vm4 = vcmp.lt.s32.totalorder %v623_v9, 0  ;;  %vm355_vm5 = vcmp.le.f32.partialorder %v354_v62, 0.7853982 }
  0xe3   :  { %v545_v41 = vadd.s32 4294967294, %v460_v14  ;;  %v516_v36 = vmul.f32 %v510_v48, %v198_v58  ;;  %v478_v50 = vsub.s32 4, %v941_v22  ;;  %vm497_vm9 = vweird.f32 %v623_v9 }
  0xe4   :  { %v341_v5 = vmul.f32 %v340_v37, %v325_v20  ;;  %v350_v17 = vxor.u32 2147483648, %v333_v3 }
  0xe5   :  { %vm546_vm1 = vcmp.lt.s32.totalorder %v545_v41, 0  ;;  %519 = vst [vmem:[#allocation2] sm:$0xff] %v516_v36  ;;  %v479_v55 = vsel %vm356_vm4, %v478_v50, %v941_v22  ;;  %v512_v22 = vperm.slane %v958_v18, 2 }
  0xe6   :  { %v347_v40 = vxor.u32 2147483648, %v341_v5  ;;  %v351_v19 = vsel %vm349_vm0, %v350_v17, %v341_v5  ;;  %v463_v20 = vsel %vm546_vm1, 0, %v545_v41  ;;  %v481_v51 = vsel %vm355_vm5, 0, %v479_v55 }
  0xe7   :  { %v464_v38 = vsub.s32 32, %v463_v20  ;;  %v468_v12 = vsub.s32 4294967266, %v463_v20  ;;  %v465_v42 = vshll.u32 %v456_v15, %v463_v20  ;;  %v498_v63 = vadd.s32 3, %v481_v51 }
  0xe8   :  { %v348_v34 = vsel %vm346_vm14, %v333_v3, %v347_v40 }
  0xe9   :  { %v352_v43 = vsel %vm345_vm15, %v348_v34, %v351_v19  ;;  %v466_v30 = vshrl.u32 %v448_v35, %v464_v38  ;;  %v469_v44 = vadd.s32 127, %v468_v12  ;;  %v499_v28 = vand.u32 3, %v498_v63 }
  0xea   :  { %v353_v47 = vsel %vm342_vm3, nan, %v352_v43 }
  0xeb   :  { %v467_v57 = vor.u32 %v466_v30, %v465_v42  ;;  %v470_v49 = vshll.u32 %v469_v44, 23  ;;  %v517_v54 = vmul.f32 %v511_v4, %v353_v47  ;;  %vm501_vm6 = vcmp.eq.s32.totalorder %v499_v28, 0 }
  0xec   :  { %vm504_vm7 = vcmp.eq.s32.totalorder %v499_v28, 2  ;;  %vm500_vm8 = vcmp.lt.s32.totalorder %v499_v28, 2 }
  0xed   :  { %v471_v10 = vor.u32 4788187, %v470_v49  ;;  %v474_v21 = vcvt.s32.f32 %v467_v57  ;;  %520 = vst [vmem:[#allocation2 + $0x8] sm:$0xff] %v517_v54 }
  0xef   :  { %v472_v60 = vand.u32 2147483647, %v471_v10 }
  0xf1   :  { %v475_v7 = vmul.f32 %v474_v21, %v472_v60 }
  0xf3   :  { %v476_v8 = vxor.u32 2147483648, %v475_v7 }
  0xf5   :  { %v477_v11 = vsel %vm356_vm4, %v476_v8, %v475_v7 }
  0xf6   :  { %v480_v53 = vsel %vm355_vm5, %v623_v9, %v477_v11 }
  0xf7   :  { %v482_v39 = vmul.f32 %v480_v53, %v480_v53 }
  0xf9   :  { %v483_v24 = vmul.f32 -0.001358992, %v482_v39  ;;  %v490_v29 = vmul.f32 -0.00019511016, %v482_v39 }
  0xfb   :  { %v484_v45 = vadd.f32 0.041655596, %v483_v24  ;;  %v491_v31 = vadd.f32 0.008332121, %v490_v29 }
  0xfd   :  { %v485_v61 = vmul.f32 %v484_v45, %v482_v39  ;;  %v492_v33 = vmul.f32 %v491_v31, %v482_v39 }
  0xff   :  { %v486_v56 = vadd.f32 -0.4999988, %v485_v61  ;;  %v493_v23 = vadd.f32 -0.16666654, %v492_v33 }
 0x101   :  { %v487_v15 = vmul.f32 %v486_v56, %v482_v39  ;;  %v494_v62 = vmul.f32 %v493_v23, %v482_v39 }
 0x103   :  { %v488_v2 = vadd.f32 1.0, %v487_v15  ;;  %v495_v25 = vadd.f32 1.0, %v494_v62 }
 0x105   :  { %v496_v0 = vmul.f32 %v495_v25, %v480_v53  ;;  %v505_v6 = vxor.u32 2147483648, %v488_v2 }
 0x107   :  { %v502_v27 = vxor.u32 2147483648, %v496_v0  ;;  %v506_v37 = vsel %vm504_vm7, %v505_v6, %v496_v0 }
 0x109   :  { %v503_v3 = vsel %vm501_vm6, %v488_v2, %v502_v27 }
 0x10a   :  { %v507_v59 = vsel %vm500_vm8, %v503_v3, %v506_v37 }
 0x10b   :  { %v508_v26 = vsel %vm497_vm9, nan, %v507_v59 }
 0x10c   :  { %v518_v1 = vmul.f32 %v512_v22, %v508_v26 }
 0x10e   :  { %521 = vst [vmem:[#allocation2 + $0x10] sm:$0xff] %v518_v1 }
 0x10f   :  { %532 = dma.vmem_to_hbm [thread:$0]  %s528_s1, 384, %s530_s15, [#allocation3]  }
 0x110   :  { %582 = dma.done.wait [#allocation3], 384  }
 0x111   :  { %583 = vsyncadd [#allocation3], 4294966912 }
 0x112   :  { %537 = vsyncpa [#allocation3], 1 }

</bundles_post_ra>
